<compile_context>
chip_gen: v7x
topology: tpu7x:2x2x1
jax: 0.10.0
libtpu: 0.0.40
codegen_flags: <defaults>
</compile_context>

<pallas_src>
import functools

import jax
import jax.numpy as jnp
import numpy as np
from jax.experimental import pallas as pl
from jax.experimental.pallas import tpu as pltpu


def _edge_keys(num_nodes):
    # mirrors Cell.__init__ / _edge2index: keys '{i}<-{j}', sorted lexicographically
    keys = []
    for i in range(1, num_nodes):
        for j in range(i):
            keys.append('{:}<-{:}'.format(i, j))
    return sorted(keys)


def _round_up(x, m):
    return (x + m - 1) // m * m


def _allot_cell_kernel(x_ref, st_ref, w_ref, out_tt_ref, out_st_ref, act_ref,
                       *, num_nodes, channels, node_out, col_offsets):
    """One (batch, spatial-tile) grid step.

    x_ref, st_ref : [1, C, tile_m]   channel-major, lane-dense activation tiles (md dtype)
    w_ref         : [2C, K_pad]      packed block-diagonal per-node weights (md dtype)
    out_tt_ref    : [1, C, tile_m]
    out_st_ref    : [1, C, tile_m]
    act_ref       : [(num_nodes-1)*2C, tile_m] stacked fused (tt;st) activations (md)
    """
    C = channels
    C2 = 2 * C
    md = act_ref.dtype

    # Fused node-0 activation: tt rows [0:C], st rows [C:2C].
    x0 = jnp.concatenate([x_ref[0], st_ref[0]], axis=0)        # [2C, tile_m]
    act_ref[0:C2, :] = x0.astype(md)

    ret = x0.astype(jnp.float32) if node_out != 'other' else None

    # Statically-unrolled node loop: one fused MXU matmul per DAG node.
    for i in range(1, num_nodes):
        k = 2 * i * C
        off = col_offsets[i - 1]
        a = act_ref[0:i * C2, :]                                # [2iC, tile_m]
        w = w_ref[:, off:off + k]                               # [2C, 2iC]
        node = jnp.dot(w, a, preferred_element_type=jnp.float32)   # [2C, tile_m] f32
        if i < num_nodes - 1:                                   # last node never feeds forward
            act_ref[i * C2:(i + 1) * C2, :] = node.astype(md)
        ret = node if ret is None else ret + node

    out_tt_ref[0] = ret[0:C, :].astype(out_tt_ref.dtype)
    out_st_ref[0] = ret[C:C2, :].astype(out_st_ref.dtype)


def allot_cell_forward(x, st, alphas, w_tt, w_st, *,
                       x_mark=None, attn_mask=None, adj_mats=None,
                       num_nodes=4, node_out='other',
                       tile_m=None, matmul_dtype=jnp.bfloat16):
    """x, st: NCHW [B, C, H, W]. Returns (ret_tt, ret_st) in NCHW (f32-accumulated)."""
    B, C, H, W = x.shape
    M = H * W
    num_edges, num_ops = alphas.shape
    assert num_nodes >= 2
    assert num_edges == num_nodes * (num_nodes - 1) // 2
    # lexicographic edge-key order only matches numeric (node-major) order for <= 10 nodes
    assert num_nodes <= 10
    assert C % 8 == 0

    out_dtype = x.dtype
    md = jnp.dtype(matmul_dtype) if matmul_dtype is not None else x.dtype

    # --- tile_m selection: big lane-dense tiles, v7x VMEM + megacore aware ---
    if tile_m is None:
        cap = 8192  # ~11 MiB working set at C=32 bf16 -> inside v7x's 32 MiB scoped default
        tile_m = M
        if tile_m > cap:
            t = cap
            while t >= 128 and M % t != 0:
                t -= 128
            tile_m = t if t >= 128 else M
        # v7x has 2 TensorCores sharded over "parallel" grid axes: keep >= 2 grid points.
        if B * (M // tile_m) < 2 and tile_m % 256 == 0:
            tile_m //= 2
    assert M % tile_m == 0 and tile_m % 128 == 0, \
        "H*W must be a multiple of tile_m (and tile_m of 128)"

    # --- grid-invariant work hoisted out of the kernel (plain XLA) ---
    op_w = jax.nn.softmax(alphas.astype(jnp.float32), axis=-1)                 # [E, K]
    # Effective per-edge weights (mixture over candidate ops), stored transposed
    # ([C_out, C_in]) so the kernel computes out^T = W_eff^T @ x^T on lane-dense tiles.
    w_tt_eff_t = jnp.einsum('ek,ekio->eoi', op_w, w_tt.astype(jnp.float32))    # [E,C,C]
    w_st_eff_t = jnp.einsum('ek,ekio->eoi', op_w, w_st.astype(jnp.float32))

    edge2idx = {k: e for e, k in enumerate(_edge_keys(num_nodes))}

    # Per-node fused block-diagonal weights [[Wtt,0],[0,Wst]] per predecessor, stacked
    # along K -> [2C, 2iC]; all nodes packed into one array with 128-aligned offsets.
    zc = jnp.zeros((C, C), jnp.float32)
    node_blocks, col_offsets = [], []
    off = 0
    for i in range(1, num_nodes):
        blocks = []
        for j in range(i):
            e = edge2idx['{:}<-{:}'.format(i, j)]
            top = jnp.concatenate([w_tt_eff_t[e], zc], axis=1)                 # [C, 2C]
            bot = jnp.concatenate([zc, w_st_eff_t[e]], axis=1)                 # [C, 2C]
            blocks.append(jnp.concatenate([top, bot], axis=0))                 # [2C, 2C]
        wn = jnp.concatenate(blocks, axis=1)                                   # [2C, 2iC]
        k = 2 * i * C
        k_pad = _round_up(k, 128)
        if k_pad > k:
            wn = jnp.concatenate([wn, jnp.zeros((2 * C, k_pad - k), jnp.float32)], axis=1)
        node_blocks.append(wn)
        col_offsets.append(off)
        off += k_pad
    w_packed = jnp.concatenate(node_blocks, axis=1).astype(md)                 # [2C, K_pad]
    K_pad = w_packed.shape[1]

    # NCHW flattens natively to channel-major [B, C, H*W]; cast to matmul dtype so
    # HBM DMA and VMEM buffers are half-size in bf16 mode.
    xf = x.reshape(B, C, M).astype(md)
    stf = st.reshape(B, C, M).astype(md)

    kernel = functools.partial(_allot_cell_kernel, num_nodes=num_nodes, channels=C,
                               node_out=node_out, col_offsets=tuple(col_offsets))

    act_spec = pl.BlockSpec((1, C, tile_m), lambda b, m: (b, 0, m))
    w_spec = pl.BlockSpec((2 * C, K_pad), lambda b, m: (0, 0))
    out_spec = pl.BlockSpec((1, C, tile_m), lambda b, m: (b, 0, m))

    out_tt, out_st = pl.pallas_call(
        kernel,
        out_shape=(jax.ShapeDtypeStruct((B, C, M), out_dtype),
                   jax.ShapeDtypeStruct((B, C, M), out_dtype)),
        grid_spec=pltpu.PrefetchScalarGridSpec(
            num_scalar_prefetch=0,
            grid=(B, M // tile_m),
            in_specs=[act_spec, act_spec, w_spec],
            out_specs=(out_spec, out_spec),
            scratch_shapes=[
                pltpu.VMEM(((num_nodes - 1) * 2 * C, tile_m), md),  # stacked fused acts
            ]),
        compiler_params=pltpu.CompilerParams(
            dimension_semantics=("parallel", "parallel")),
    )(xf, stf, w_packed)

    return out_tt.reshape(B, C, H, W), out_st.reshape(B, C, H, W)


def allot_cell_reference(x, st, alphas, w_tt, w_st, *, num_nodes=4, node_out='other'):
    """Pure-JAX reference of the same math (independent layout path, for verification)."""
    B, C, H, W = x.shape
    xf = jnp.transpose(x, (0, 2, 3, 1)).reshape(-1, C).astype(jnp.float32)
    stf = jnp.transpose(st, (0, 2, 3, 1)).reshape(-1, C).astype(jnp.float32)
    op_w = jax.nn.softmax(alphas.astype(jnp.float32), axis=-1)
    edge2idx = {k: e for e, k in enumerate(_edge_keys(num_nodes))}

    nodes_tt, nodes_st = [xf], [stf]
    for i in range(1, num_nodes):
        acc_tt = 0.0
        acc_st = 0.0
        for j in range(i):
            e = edge2idx['{:}<-{:}'.format(i, j)]
            w_tt_eff = jnp.einsum('k,kcd->cd', op_w[e], w_tt[e].astype(jnp.float32))
            w_st_eff = jnp.einsum('k,kcd->cd', op_w[e], w_st[e].astype(jnp.float32))
            acc_tt = acc_tt + nodes_tt[j] @ w_tt_eff
            acc_st = acc_st + nodes_st[j] @ w_st_eff
        nodes_tt.append(acc_tt)
        nodes_st.append(acc_st)

    start = 1 if node_out == 'other' else 0
    ret_tt = sum(nodes_tt[start:])
    ret_st = sum(nodes_st[start:])
    ret_tt = ret_tt.reshape(B, H, W, C).transpose(0, 3, 1, 2)
    ret_st = ret_st.reshape(B, H, W, C).transpose(0, 3, 1, 2)
    return ret_tt, ret_st


if __name__ == "__main__":
    # Small, deterministic setup consistent with the module:
    # channels=32, num_nodes=4 -> 6 edges, 3 candidate ops.
    B, C, H, W = 2, 32, 8, 16
    NUM_NODES = 4
    NUM_EDGES = NUM_NODES * (NUM_NODES - 1) // 2
    NUM_OPS = 3

    key = jax.random.PRNGKey(0)
    kx, kst, ka, kwt, kws = jax.random.split(key, 5)

    x = jax.random.normal(kx, (B, C, H, W), jnp.float32)
    st = jax.random.normal(kst, (B, C, H, W), jnp.float32)          # kwargs['st']
    alphas = 0.001 * jax.random.normal(ka, (NUM_EDGES, NUM_OPS), jnp.float32)
    scale = 1.0 / jnp.sqrt(jnp.float32(C))
    w_tt = scale * jax.random.normal(kwt, (NUM_EDGES, NUM_OPS, C, C), jnp.float32)
    w_st = scale * jax.random.normal(kws, (NUM_EDGES, NUM_OPS, C, C), jnp.float32)

    ref_tt, ref_st = allot_cell_reference(x, st, alphas, w_tt, w_st,
                                          num_nodes=NUM_NODES, node_out='other')

    # 1) f32 MXU operands: tight structural correctness check.
    tt32, st32 = allot_cell_forward(x, st, alphas, w_tt, w_st,
                                    num_nodes=NUM_NODES, node_out='other',
                                    matmul_dtype=None)
    jax.block_until_ready((tt32, st32))
    assert tt32.shape == (B, C, H, W) and st32.shape == (B, C, H, W)
    assert np.allclose(np.asarray(tt32), np.asarray(ref_tt), rtol=2e-3, atol=2e-3)
    assert np.allclose(np.asarray(st32), np.asarray(ref_st), rtol=2e-3, atol=2e-3)

    # 2) bf16 MXU operands (default fast path): loose accuracy check
    #    (activations re-quantized to bf16 between DAG levels -> compounding error).
    ttbf, stbf = allot_cell_forward(x, st, alphas, w_tt, w_st,
                                    num_nodes=NUM_NODES, node_out='other')
    jax.block_until_ready((ttbf, stbf))
    ref_tt_np = np.asarray(ref_tt)
    ref_st_np = np.asarray(ref_st)
    err_tt = np.max(np.abs(np.asarray(ttbf) - ref_tt_np)) / (np.max(np.abs(ref_tt_np)) + 1e-6)
    err_st = np.max(np.abs(np.asarray(stbf) - ref_st_np)) / (np.max(np.abs(ref_st_np)) + 1e-6)
    assert err_tt < 8e-2 and err_st < 8e-2, (err_tt, err_st)

    print("KERNEL_OK")
</pallas_src>

<mosaic_0001>
module attributes {stable_mosaic.version = 11 : i64} {
  func.func @_allot_cell_kernel(%arg0: i32, %arg1: i32, %arg2: memref<1x32x128xf32, #tpu.memory_space<vmem>>, %arg3: memref<1x32x128xf32, #tpu.memory_space<vmem>>, %arg4: memref<64x512xf32, #tpu.memory_space<vmem>>, %arg5: memref<1x32x128xf32, #tpu.memory_space<vmem>>, %arg6: memref<1x32x128xf32, #tpu.memory_space<vmem>>, %arg7: memref<192x128xf32, #tpu.memory_space<vmem>>) attributes {dimension_semantics = [#tpu.dimension_semantics<parallel>, #tpu.dimension_semantics<parallel>], iteration_bounds = array<i64: 2, 1>, scalar_prefetch = 0 : i64, scratch_operands = 1 : i64, tpu.core_type = #tpu.core_type<tc>, window_params = [{transform_indices = @transform_0, window_bounds = array<i64: 1, 32, 128>}, {transform_indices = @transform_1, window_bounds = array<i64: 1, 32, 128>}, {pipeline_mode = #tpu.pipeline_mode<synchronous>, transform_indices = @transform_2, window_bounds = array<i64: 64, 512>}, {transform_indices = @transform_3, window_bounds = array<i64: 1, 32, 128>}, {transform_indices = @transform_4, window_bounds = array<i64: 1, 32, 128>}]} {
    %c0 = arith.constant 0 : index
    %c0_0 = arith.constant 0 : index
    %c0_1 = arith.constant 0 : index
    %0 = vector.load %arg2[%c0, %c0_0, %c0_1] : memref<1x32x128xf32, #tpu.memory_space<vmem>>, vector<1x32x128xf32>
    %1 = vector.shape_cast %0 : vector<1x32x128xf32> to vector<32x128xf32>
    %c0_2 = arith.constant 0 : index
    %c0_3 = arith.constant 0 : index
    %c0_4 = arith.constant 0 : index
    %2 = vector.load %arg3[%c0_2, %c0_3, %c0_4] : memref<1x32x128xf32, #tpu.memory_space<vmem>>, vector<1x32x128xf32>
    %3 = vector.shape_cast %2 : vector<1x32x128xf32> to vector<32x128xf32>
    %4 = tpu.concatenate %1, %3 in 0 : vector<32x128xf32>, vector<32x128xf32> -> vector<64x128xf32>
    %c0_5 = arith.constant 0 : index
    %c0_6 = arith.constant 0 : index
    %5 = vector.load %arg7[%c0_5, %c0_6] : memref<192x128xf32, #tpu.memory_space<vmem>>, vector<64x128xf32>
    tpu.vector_store %arg7[%c0_5, %c0_6], %4 {strides = array<i32>} : memref<192x128xf32, #tpu.memory_space<vmem>>, vector<64x128xf32>,
    %c0_7 = arith.constant 0 : index
    %c0_8 = arith.constant 0 : index
    %6 = vector.load %arg7[%c0_7, %c0_8] : memref<192x128xf32, #tpu.memory_space<vmem>>, vector<64x128xf32>
    %c0_9 = arith.constant 0 : index
    %c0_10 = arith.constant 0 : index
    %7 = vector.load %arg4[%c0_9, %c0_10] : memref<64x512xf32, #tpu.memory_space<vmem>>, vector<64x64xf32>
    %cst = arith.constant dense<0.000000e+00> : vector<64x128xf32>
    %8 = tpu.matmul %7, %6, %cst {dimension_numbers = #tpu.dot_dimension_numbers<[1], [0], [0], [1], [0, 0, 1, 1], [], []>} : vector<64x64xf32>, vector<64x128xf32>, vector<64x128xf32> -> vector<64x128xf32>
    %c64 = arith.constant 64 : index
    %c0_11 = arith.constant 0 : index
    %9 = vector.load %arg7[%c64, %c0_11] : memref<192x128xf32, #tpu.memory_space<vmem>>, vector<64x128xf32>
    tpu.vector_store %arg7[%c64, %c0_11], %8 {strides = array<i32>} : memref<192x128xf32, #tpu.memory_space<vmem>>, vector<64x128xf32>,
    %c0_12 = arith.constant 0 : index
    %c0_13 = arith.constant 0 : index
    %10 = vector.load %arg7[%c0_12, %c0_13] : memref<192x128xf32, #tpu.memory_space<vmem>>, vector<128x128xf32>
    %c0_14 = arith.constant 0 : index
    %c128 = arith.constant 128 : index
    %11 = vector.load %arg4[%c0_14, %c128] : memref<64x512xf32, #tpu.memory_space<vmem>>, vector<64x128xf32>
    %cst_15 = arith.constant dense<0.000000e+00> : vector<64x128xf32>
    %12 = tpu.matmul %11, %10, %cst_15 {dimension_numbers = #tpu.dot_dimension_numbers<[1], [0], [0], [1], [0, 0, 1, 1], [], []>} : vector<64x128xf32>, vector<128x128xf32>, vector<64x128xf32> -> vector<64x128xf32>
    %c128_16 = arith.constant 128 : index
    %c0_17 = arith.constant 0 : index
    %13 = vector.load %arg7[%c128_16, %c0_17] : memref<192x128xf32, #tpu.memory_space<vmem>>, vector<64x128xf32>
    tpu.vector_store %arg7[%c128_16, %c0_17], %12 {strides = array<i32>} : memref<192x128xf32, #tpu.memory_space<vmem>>, vector<64x128xf32>,
    %14 = arith.addf %8, %12 : vector<64x128xf32>
    %c0_18 = arith.constant 0 : index
    %c0_19 = arith.constant 0 : index
    %15 = vector.load %arg7[%c0_18, %c0_19] : memref<192x128xf32, #tpu.memory_space<vmem>>, vector<192x128xf32>
    %c0_20 = arith.constant 0 : index
    %c256 = arith.constant 256 : index
    %16 = vector.load %arg4[%c0_20, %c256] : memref<64x512xf32, #tpu.memory_space<vmem>>, vector<64x192xf32>
    %cst_21 = arith.constant dense<0.000000e+00> : vector<64x128xf32>
    %17 = tpu.matmul %16, %15, %cst_21 {dimension_numbers = #tpu.dot_dimension_numbers<[1], [0], [0], [1], [0, 0, 1, 1], [], []>} : vector<64x192xf32>, vector<192x128xf32>, vector<64x128xf32> -> vector<64x128xf32>
    %18 = arith.addf %14, %17 : vector<64x128xf32>
    %19 = vector.extract_strided_slice %18 {offsets = [0, 0], sizes = [32, 128], strides = [1, 1]} : vector<64x128xf32> to vector<32x128xf32>
    %c0_22 = arith.constant 0 : index
    %c0_23 = arith.constant 0 : index
    %c0_24 = arith.constant 0 : index
    %20 = vector.load %arg5[%c0_22, %c0_23, %c0_24] : memref<1x32x128xf32, #tpu.memory_space<vmem>>, vector<1x32x128xf32>
    %21 = vector.shape_cast %20 : vector<1x32x128xf32> to vector<32x128xf32>
    %22 = vector.shape_cast %19 : vector<32x128xf32> to vector<1x32x128xf32>
    tpu.vector_store %arg5[%c0_22, %c0_23, %c0_24], %22 {strides = array<i32>} : memref<1x32x128xf32, #tpu.memory_space<vmem>>, vector<1x32x128xf32>,
    %23 = vector.extract_strided_slice %18 {offsets = [32, 0], sizes = [32, 128], strides = [1, 1]} : vector<64x128xf32> to vector<32x128xf32>
    %c0_25 = arith.constant 0 : index
    %c0_26 = arith.constant 0 : index
    %c0_27 = arith.constant 0 : index
    %24 = vector.load %arg6[%c0_25, %c0_26, %c0_27] : memref<1x32x128xf32, #tpu.memory_space<vmem>>, vector<1x32x128xf32>
    %25 = vector.shape_cast %24 : vector<1x32x128xf32> to vector<32x128xf32>
    %26 = vector.shape_cast %23 : vector<32x128xf32> to vector<1x32x128xf32>
    tpu.vector_store %arg6[%c0_25, %c0_26, %c0_27], %26 {strides = array<i32>} : memref<1x32x128xf32, #tpu.memory_space<vmem>>, vector<1x32x128xf32>,
    return
  }
  func.func @transform_0(%arg0: i32, %arg1: i32) -> (i32, i32, i32) {
    %c0_i32 = arith.constant 0 : i32
    %c0_i32_0 = arith.constant 0 : i32
    return %arg0, %c0_i32, %arg1 : i32, i32, i32
  }
  func.func @transform_1(%arg0: i32, %arg1: i32) -> (i32, i32, i32) {
    %c0_i32 = arith.constant 0 : i32
    %c0_i32_0 = arith.constant 0 : i32
    return %arg0, %c0_i32, %arg1 : i32, i32, i32
  }
  func.func @transform_2(%arg0: i32, %arg1: i32) -> (i32, i32) {
    %c0_i32 = arith.constant 0 : i32
    %c0_i32_0 = arith.constant 0 : i32
    %c0_i32_1 = arith.constant 0 : i32
    return %c0_i32, %c0_i32_0 : i32, i32
  }
  func.func @transform_3(%arg0: i32, %arg1: i32) -> (i32, i32, i32) {
    %c0_i32 = arith.constant 0 : i32
    %c0_i32_0 = arith.constant 0 : i32
    return %arg0, %c0_i32, %arg1 : i32, i32, i32
  }
  func.func @transform_4(%arg0: i32, %arg1: i32) -> (i32, i32, i32) {
    %c0_i32 = arith.constant 0 : i32
    %c0_i32_0 = arith.constant 0 : i32
    return %arg0, %c0_i32, %arg1 : i32, i32, i32
  }
}

</mosaic_0001>

<bundles_post_ra>
// kernel: tpu_custom_call.1
= control target key start
LH: loop header
LB: loop body
LE: loop exit
PB: predicated region body
PF: predicated region fallthrough
CT: control target
= control target key end

     0   :  { %s1931_s0 = inlined_call_operand.hbm [shape: f32[2,32,128], index: 0, kind: input, shape index: {}]   ;;  %s1932_s1 = inlined_call_operand.hbm [shape: f32[2,32,128], index: 1, kind: input, shape index: {}]   ;;  %s1933_s2 = inlined_call_operand.hbm [shape: f32[64,512], index: 2, kind: input, shape index: {}]   ;;  %s1934_s3 = inlined_call_operand.hbm [shape: f32[2,32,128], index: 3, kind: output, shape index: {0}]   ;;  %s1935_s4 = inlined_call_operand.hbm [shape: f32[2,32,128], index: 4, kind: output, shape index: {1}]  }
   0x1   :  { %1940 = sst [smem:[#allocation18_spill]] %s1931_s0 }
   0x2   :  { %1941 = sst [smem:[#allocation19_spill]] %s1933_s2 }
   0x3   :  { %10 = vsyncpa [#allocation4], 0 }
   0x4   :  { %12 = vsyncpa [#allocation4 + $0x1], 0 }
   0x5   :  { %13 = vsyncpa [#allocation7], 0 }
   0x6   :  { %15 = vsyncpa [#allocation7 + $0x1], 0 }
   0x7   :  { %16 = vsyncpa [#allocation5], 0 }
   0x8   :  { %18 = vsyncpa [#allocation5 + $0x1], 0 }
   0x9   :  { %19 = vsyncpa [#allocation11], 0 }
   0xa   :  { %21 = vsyncpa [#allocation11 + $0x1], 0  ;;  %s1573_s15 = smov 0   ;;  %s1575_s16 = smov 0  }
   0xb   :  { %s1577_s17 = smov 0   ;;  %s1579_s18 = smov 0  }
   0xc   :  { %s1581_s19 = smov 0   ;;  %s1583_s20 = smov 0  }
   0xd LB: > { %s1604_s21 = sadd.s32 4294967295, %s1534_s20   ;;  %s994_s22 = sadd.s32 4294967294, %s1534_s20   ;;  %s1534_s20 = sphi %s1583_s20, %s27_s20   ;;  %s1530_s19 = sphi %s1581_s19, %s1964_s19   ;;  %s1526_s18 = sphi %s1579_s18, %s1963_s18   ;;  %s1522_s17 = sphi %s1577_s17, %s1962_s17   ;;  %s1518_s16 = sphi %s1575_s16, %s1961_s16   ;;  %s1514_s15 = sphi %s1573_s15, %s1960_s15  }
   0xe   : > { %p61_p0 = scmp.ne.s32.totalorder %s1518_s16, %s1514_s15  ;;  %p1936_p1 = scmp.eq.s32.totalorder %s1604_s21, 0 }
   0xf   : > { %p142_p3 = scmp.eq.s32.totalorder %s994_s22, 1  ;;  %p995_p5 = scmp.ge.s32.totalorder %s1534_s20, 1 }
  0x10   : > { %p1613_p4 = por %p1936_p1, %p61_p0  ;;  %p177_p7 = scmp.lt.s32.totalorder %s1534_s20, 3 }
  0x11   : > { %p1618_p6 = por %p142_p3, %p61_p0  ;;  %s1536_s26 = smov [#allocation8]  }
  0x12   : > { %s1942_s23 = scalar_select %p1613_p4, 1, 0 }
  0x13   : > { %s1943_s24 = scalar_select %p1618_p6, 1, 0 }
  0x14   : > { %p1623_p8 = pnand %p995_p5, %p177_p7  ;;  %s189_s27 = sshll.u32 %s1536_s26, 4  ;;  %s190_s27 = int_to_ptr.vmem [resolvable:$true] %s189_s27 }
  0x15   : > { %s39_s29 = sadd.s32 1, %s1530_s19  ;;  %s1946_s2 = sld [smem:[#allocation19_spill]] }
  0x16   : > { %s1944_s25 = scalar_select %p1623_p8, 1, 0 }
  0x17   : > { %p1246_p9 = pneg %p1623_p8 }
  0x19   : > { %p1632_p11 = pnand %p1246_p9, %p1936_p1 }
  0x1b   : > { %s1324_s6 = scalar_lea.hbm %s1946_s2, 4096  ;;  %p1326_p13 = pneg %p1632_p11 }
  0x1c   : > { %p1325_p12 = scmp.ne.s32.totalorder %s1946_s2, %s1324_s6  ;;  %p1331_p5 = scmp.lt.u32.totalorder %s1324_s6, %s1946_s2 }
  0x1e   : > { %p1327_p0 = pnand %p1326_p13, %p1325_p12 }
  0x20   : > { %p1328_p3 = pneg %p1327_p0 }
  0x22   : > { %p1333_p7 = pnand %p1331_p5, %p1328_p3 }
  0x24   : > { %1336 = shalt.err (!%p1333_p7)
}
  0x25   : > { %s1337_s11 = scalar_lea.vmem %s190_s27, 4096  ;;  %p1345_p2 = scmp.lt.s32.totalorder %s190_s27, %s190_s27 }
  0x26   : > { %p1338_p9 = scmp.ne.s32.totalorder %s190_s27, %s1337_s11  ;;  %p1346_p6 = scmp.lt.s32.totalorder %s1337_s11, %s1337_s11 }
  0x28   : > { %p1340_p10 = pnand %p1338_p9, %p1326_p13  ;;  %p1347_p4 = por %p1346_p6, %p1345_p2 }
  0x2a   : > { %p1341_p1 = pneg %p1340_p10 }
  0x2c   : > { %p1348_p8 = pnand %p1347_p4, %p1341_p1 }
  0x2e   : > { %1351 = shalt.err (!%p1348_p8)
}
  0x2f   : > { %s1537_s12 = smov 512   ;;  %s1538_s13 = smov 32  }
  0x30   : > { %1249 = dma.hbm_to_vmem [thread:$0]  (!%p1632_p11), %s1946_s2, 4096, %s190_s27, [#allocation7], %s1537_s12, %s1537_s12, %s1538_s13  }
  0x31   : > { %p41_p1 = scmp.ge.s32.totalorder %s39_s29, 2  ;;  %s48_s26 = sadd.s32 1, %s1522_s17 }
  0x32   : > { %p55_p2 = scmp.ne.s32.totalorder %s1522_s17, %s1518_s16  ;;  %p56_p4 = scmp.eq.s32.totalorder %s1534_s20, 0 }
  0x33   : > { %s1966_s29 = smov (%p41_p1, %s39_s29), 0  ;;  %p1949_p8 = scmp.eq.s32.totalorder %s1604_s21, 1 }
  0x34   : > { %1947 = sst [smem:[#allocation17_spill]] %s1966_s29  ;;  %p1659_p6 = por %p56_p4, %p55_p2 }
  0x35   : > { %p1665_p10 = por %p1949_p8, %p55_p2  ;;  %s43_s5 = ssub.s32 %s1530_s19, %s1966_s29 }
  0x36   : > { %p1265_p12 = scmp.lt.s32.totalorder %s1534_s20, 2  ;;  %p46_p11 = scmp.eq.s32.totalorder %s43_s5, 0 }
  0x37   : > { %s203_s27 = sand.u32 1, %s1522_s17   ;;  %s1034_s8 = sshll.u32 %s1530_s19, 9 }
  0x38   : > { %s1673_s6 = sshll.u32 %s203_s27, 5  ;;  %s1951_s0 = sld [smem:[#allocation18_spill]] }
  0x39   : > { %s1676_s7 = scalar_select %p46_p11, %s1522_s17, %s48_s26  }
  0x3a   : > { %s207_s12 = scalar_lea.vmem [#allocation3], %s1673_s6  ;;  %p1691_p13 = pnand %p1265_p12, %p1659_p6 }
  0x3b   : > { %s215_s13 = sshll.u32 %s207_s12, 4  ;;  %s1695_s22 = scalar_lea.sflag [#allocation4], %s203_s27  ;;  %s1687_s13 = int_to_ptr.vmem [resolvable:$true] %s215_s13 }
  0x3c   : > { %p1354_p3 = pneg %p1691_p13 }
  0x3e   : > { %s1684_s11 = scalar_lea.hbm %s1951_s0, %s1034_s8  ;;  %s1357_s30 = scalar_lea.hbm %s1951_s0, 1024 }
  0x3f   : > { %s1352_s26 = scalar_lea.hbm %s1684_s11, 512  ;;  %p1358_p9 = scmp.lt.u32.totalorder %s1684_s11, %s1951_s0 }
  0x40   : > { %p1353_p0 = scmp.ne.s32.totalorder %s1684_s11, %s1352_s26  ;;  %p1359_p1 = scmp.lt.u32.totalorder %s1357_s30, %s1352_s26 }
  0x41   : > { %p1361_p4 = scmp.lt.u32.totalorder %s1352_s26, %s1684_s11 }
  0x42   : > { %p1355_p5 = pnand %p1354_p3, %p1353_p0  ;;  %p1360_p2 = por %p1359_p1, %p1358_p9 }
  0x44   : > { %p1356_p7 = pneg %p1355_p5  ;;  %p1362_p6 = por %p1361_p4, %p1360_p2 }
  0x46   : > { %p1363_p8 = pnand %p1362_p6, %p1356_p7 }
  0x48   : > { %1366 = shalt.err (!%p1363_p8)
}
  0x49   : > { %s1367_s27 = scalar_lea.vmem %s1687_s13, 512  ;;  %s1539_s5 = smov [#allocation3]  }
  0x4a   : > { %p1368_p12 = scmp.ne.s32.totalorder %s1687_s13, %s1367_s27  ;;  %s1372_s9 = sshll.u32 %s1539_s5, 4  ;;  %s1373_s9 = int_to_ptr.vmem [resolvable:$false] %s1372_s9 }
  0x4b   : > { %s1374_s10 = scalar_lea.vmem %s1373_s9, 1024  ;;  %p1375_p5 = scmp.lt.s32.totalorder %s1687_s13, %s1373_s9 }
  0x4c   : > { %p1370_p11 = pnand %p1368_p12, %p1354_p3  ;;  %p1376_p9 = scmp.lt.s32.totalorder %s1374_s10, %s1367_s27 }
  0x4e   : > { %p1371_p0 = pneg %p1370_p11  ;;  %p1377_p1 = por %p1376_p9, %p1375_p5 }
  0x50   : > { %p1378_p2 = pnand %p1377_p1, %p1371_p0 }
  0x52   : > { %1381 = shalt.err (!%p1378_p2)
}
  0x53   : > { %s1540_s26 = smov 128   ;;  %s1541_s30 = smov 8  }
  0x54   : > { %1253 = dma.hbm_to_vmem [thread:$0]  (!%p1691_p13), %s1684_s11, 512, %s1687_s13, %s1695_s22, %s1540_s26, %s1540_s26, %s1541_s30  }
  0x55   : > { %s1731_s5 = scalar_lea.hbm %s1932_s1, %s1034_s8  ;;  %s229_s9 = scalar_lea.vmem [#allocation6], %s1673_s6 }
  0x56   : > { %s237_s10 = sshll.u32 %s229_s9, 4  ;;  %s225_s0 = sand.u32 1, %s1534_s20   ;;  %s1734_s10 = int_to_ptr.vmem [resolvable:$true] %s237_s10 }
  0x57   : > { %s1737_s2 = scalar_lea.sflag [#allocation7], %s225_s0  ;;  %s1382_s29 = scalar_lea.hbm %s1731_s5, 512 }
  0x58   : > { %p1383_p7 = scmp.ne.s32.totalorder %s1731_s5, %s1382_s29  ;;  %s1387_s13 = scalar_lea.hbm %s1932_s1, 1024 }
  0x59   : > { %p1388_p8 = scmp.lt.u32.totalorder %s1731_s5, %s1932_s1  ;;  %p1389_p12 = scmp.lt.u32.totalorder %s1387_s13, %s1382_s29 }
  0x5a   : > { %p1385_p4 = pnand %p1383_p7, %p1354_p3  ;;  %p1391_p0 = scmp.lt.u32.totalorder %s1382_s29, %s1731_s5 }
  0x5b   : > { %p1390_p11 = por %p1389_p12, %p1388_p8 }
  0x5c   : > { %p1386_p6 = pneg %p1385_p4 }
  0x5d   : > { %p1392_p5 = por %p1391_p0, %p1390_p11 }
  0x5f   : > { %p1393_p9 = pnand %p1392_p5, %p1386_p6 }
  0x61   : > { %1396 = shalt.err (!%p1393_p9)
}
  0x62   : > { %s1397_s0 = scalar_lea.vmem %s1734_s10, 512  ;;  %s1542_s6 = smov [#allocation6]  }
  0x63   : > { %p1398_p1 = scmp.ne.s32.totalorder %s1734_s10, %s1397_s0  ;;  %s1402_s27 = sshll.u32 %s1542_s6, 4  ;;  %s1403_s27 = int_to_ptr.vmem [resolvable:$false] %s1402_s27 }
  0x64   : > { %s1404_s9 = scalar_lea.vmem %s1403_s27, 1024  ;;  %p1405_p4 = scmp.lt.s32.totalorder %s1734_s10, %s1403_s27 }
  0x65   : > { %p1400_p2 = pnand %p1398_p1, %p1354_p3  ;;  %p1406_p8 = scmp.lt.s32.totalorder %s1404_s9, %s1397_s0 }
  0x67   : > { %p1401_p7 = pneg %p1400_p2  ;;  %p1407_p12 = por %p1406_p8, %p1405_p4 }
  0x69   : > { %p1408_p11 = pnand %p1407_p12, %p1401_p7 }
  0x6b   : > { %1411 = shalt.err (!%p1408_p11)
}
  0x6c   : > { %1256 = dma.hbm_to_vmem [thread:$0]  (!%p1691_p13), %s1731_s5, 512, %s1734_s10, %s1737_s2, %s1540_s26, %s1540_s26, %s1541_s30  }
  0x6d   : > { %p1953_p3 = scmp.ne.s32.totalorder %s1944_s25, 0 }
  0x6e   : > { %s1769_s29 = sand.u32 (!%p1953_p3), 1, %s1518_s16   ;;  %p1954_p6 = scmp.ne.s32.totalorder (!%p1953_p3), %s1942_s23, 0 }
  0x6f   : > { %249 = sbr.rel (%p1953_p3) target bundleno = 871 (0x367), region = 32  ;;  %s1772_s11 = sshll.u32 (!%p1953_p3), %s1769_s29, 5 }
  0x70   : > { %s252_s14 = scalar_lea.sflag (!%p1953_p3), [#allocation4], %s1769_s29  ;;  %s255_s8 = scalar_lea.vmem (!%p1953_p3), [#allocation3], %s1772_s11 }
  0x76   : > { %1493 = dma.done.wait (%p1954_p6), %s252_s14, 512  }
  0x77   : > { %1495 = vsyncadd (%p1954_p6), %s252_s14, 4294966784  ;;  %s260_s2 = sand.u32 1, %s1604_s21   ;;  %s264_s26 = scalar_lea.vmem [#allocation6], %s1772_s11 }
  0x78   : > { %s261_s25 = scalar_lea.sflag [#allocation7], %s260_s2 }
  0x79   : > { %1497 = dma.done.wait (%p1954_p6), %s261_s25, 512  }
  0x7a   : > { %1499 = vsyncadd (%p1954_p6), %s261_s25, 4294966784  ;;  %p1955_p13 = scmp.eq.s32.totalorder %s1604_s21, 0 }
  0x7c   : > { %1501 = dma.done.wait (%p1955_p13), [#allocation7], 4096   ;;  %p1956_p0 = pmov %p1955_p13 }
  0x7d   : > { %v1543_v0 = vmov 0.0|0.0   ;;  %v303_v1 = vld [vmem:[%s255_s8] sm:$0xff]  ;;  %v304_v2 = vld [vmem:[%s255_s8 + $0x8] sm:$0xff]  ;;  %v305_v3 = vld [vmem:[%s255_s8 + $0x10] sm:$0xff]  ;;  %vm335_vm0 = vcmask 523264   ;;  %s295_s21 = scalar_lea.vmem [#allocation9], %s1772_s11 }
  0x7e   : > { %1503 = vsyncadd (%p1956_p0), [#allocation7], 4294963200  ;;  %1198 = vmatprep.subr.bf16.mxu0 %v1543_v0  ;;  %v1150_v4 = vpack.c.bf16 %v304_v2, %v303_v1  ;;  %v306_v5 = vld [vmem:[%s255_s8 + $0x18] sm:$0xff]  ;;  %v307_v7 = vld [vmem:[%s264_s26] sm:$0xff]  ;;  %s823_s23 = sshll.u32 %s295_s21, 4  ;;  %s1036_s30 = sshll.u32 %s1526_s18, 9  ;;  %s1830_s23 = int_to_ptr.vmem [resolvable:$true] %s823_s23 }
  0x7f   : > { %v1154_v6 = vpack.c.bf16 %v306_v5, %v305_v3  ;;  %v308_v8 = vld [vmem:[%s264_s26 + $0x8] sm:$0xff]  ;;  %v327_v9 = vld [vmem:[#allocation8] sm:$0xff]  ;;  %v309_v11 = vld [vmem:[%s264_s26 + $0x10] sm:$0xff]  ;;  %s1837_s13 = scalar_lea.hbm %s1934_s3, %s1036_s30  ;;  %s804_s22 = scalar_lea.sflag [#allocation5], %s1769_s29 }
  0x80   : > { %1151 = vmatprep.subr.bf16.mxu1 %v1150_v4  ;;  %1094 = vmatprep.mubr.msk.f32.mxu1 %vm335_vm0, %v327_v9  ;;  %v1158_v10 = vpack.c.bf16 %v308_v8, %v307_v7  ;;  %v310_v12 = vld [vmem:[%s264_s26 + $0x18] sm:$0xff]  ;;  %v328_v14 = vld [vmem:[#allocation8 + $0x20] sm:$0xff]  ;;  %v489_v21 = vld [vmem:[#allocation8 + $0x8] sm:$0xff]  ;;  %s1412_s12 = scalar_lea.vmem %s1830_s23, 512  ;;  %s1544_s0 = smov [#allocation9]  }
  0x81   : > { %1153 = vmatpush3.bf16.msra.mxu1 %v1150_v4  ;;  %1200 = vmatpush1.bf16.msra.mxu0 %v1150_v4  ;;  %v1162_v13 = vpack.c.bf16 %v310_v12, %v309_v11  ;;  %v329_v15 = vld [vmem:[#allocation8 + $0x40] sm:$0xff]  ;;  %v490_v34 = vld [vmem:[#allocation8 + $0x28] sm:$0xff]  ;;  %v643_v41 = vld [vmem:[#allocation8 + $0x18] sm:$0xff]  ;;  %p1413_p5 = scmp.ne.s32.totalorder %s1830_s23, %s1412_s12  ;;  %s1416_s6 = sshll.u32 %s1544_s0, 4  ;;  %s1417_s6 = int_to_ptr.vmem [resolvable:$false] %s1416_s6 }
  0x82   : > { %1155 = vmatprep.subr.bf16.mxu1 %v1154_v6  ;;  %1201 = vmatprep.subr.bf16.mxu0 %v1543_v0  ;;  %v330_v16 = vld [vmem:[#allocation8 + $0x60] sm:$0xff]  ;;  %v491_v35 = vld [vmem:[#allocation8 + $0x48] sm:$0xff]  ;;  %v642_v62 = vld [vmem:[#allocation8 + $0x10] sm:$0xff]  ;;  %s1418_s27 = scalar_lea.vmem %s1417_s6, 1024  ;;  %p1419_p2 = scmp.lt.s32.totalorder %s1830_s23, %s1417_s6 }
  0x83   : > { %v331_v17 = vld [vmem:[#allocation8 + $0x80] sm:$0xff]  ;;  %v492_v36 = vld [vmem:[#allocation8 + $0x68] sm:$0xff]  ;;  %1018 = vmatprep.mubr.msk.f32.mxu0 %vm335_vm0, %v643_v41  ;;  %v645_v63 = vld [vmem:[#allocation8 + $0x38] sm:$0xff]  ;;  %p1414_p9 = pnand %p1413_p5, %p1665_p10  ;;  %p1420_p7 = scmp.lt.s32.totalorder %s1418_s27, %s1412_s12 }
  0x84   : > { %v332_v18 = vld [vmem:[#allocation8 + $0xa0] sm:$0xff]  ;;  %v493_v37 = vld [vmem:[#allocation8 + $0x88] sm:$0xff]  ;;  %v644_v1 = vld [vmem:[#allocation8 + $0x30] sm:$0xff] }
  0x85   : > { %1157 = vmatpush3.bf16.msra.mxu1 %v1154_v6  ;;  %1203 = vmatpush1.bf16.msra.mxu0 %v1154_v6  ;;  %v333_v19 = vld [vmem:[#allocation8 + $0xc0] sm:$0xff]  ;;  %v494_v38 = vld [vmem:[#allocation8 + $0xa8] sm:$0xff]  ;;  %v647_v2 = vld [vmem:[#allocation8 + $0x58] sm:$0xff]  ;;  %p1415_p1 = pneg %p1414_p9  ;;  %p1421_p4 = por %p1420_p7, %p1419_p2 }
  0x86   : > { %1159 = vmatprep.subr.bf16.mxu1 %v1158_v10  ;;  %1204 = vmatprep.subr.bf16.mxu0 %v1543_v0  ;;  %v334_v20 = vld [vmem:[#allocation8 + $0xe0] sm:$0xff]  ;;  %v495_v39 = vld [vmem:[#allocation8 + $0xc8] sm:$0xff]  ;;  %v646_v3 = vld [vmem:[#allocation8 + $0x50] sm:$0xff] }
  0x87   : > { %v496_v40 = vld [vmem:[#allocation8 + $0xe8] sm:$0xff]  ;;  %v651_v5 = vld [vmem:[#allocation8 + $0x98] sm:$0xff]  ;;  %v652_v8 = vld [vmem:[#allocation8 + $0xb0] sm:$0xff]  ;;  %p1422_p8 = pnand %p1421_p4, %p1415_p1 }
  0x88   : > { %v653_v7 = vld [vmem:[#allocation8 + $0xb8] sm:$0xff]  ;;  %v656_v12 = vld [vmem:[#allocation8 + $0xf0] sm:$0xff] }
  0x89   : > { %1161 = vmatpush3.bf16.msra.mxu1 %v1158_v10  ;;  %1206 = vmatpush1.bf16.msra.mxu0 %v1158_v10  ;;  %v655_v9 = vld [vmem:[#allocation8 + $0xd8] sm:$0xff] }
  0x8a   : > { %1163 = vmatprep.subr.bf16.mxu1 %v1162_v13  ;;  %1207 = vmatprep.subr.bf16.mxu0 %v1543_v0  ;;  %v657_v11 = vld [vmem:[#allocation8 + $0xf8] sm:$0xff] }
  0x8d   : > { %1165 = vmatpush3.bf16.msra.mxu1 %v1162_v13  ;;  %1209 = vmatpush1.bf16.msra.mxu0 %v1162_v13 }
  0x8e   : > { %1167 = vmatprep.subr.bf16.mxu1 %v1150_v4  ;;  %1210 = vmatprep.subr.bf16.mxu0 %v1543_v0 }
  0x90   : > { %1095 = vmatmul.mubr.msk.f32.vlgmr.msra.gmra.mrb[0].mxu1 %vm335_vm0, %v328_v14 }
  0x91   : > { %1097 = vmatprep.mubr.msk.f32.mxu1 %vm335_vm0, %v329_v15  ;;  %1169 = vmatpush3.bf16.msra.mxu1 %v1150_v4  ;;  %v649_v4 = vld [vmem:[#allocation8 + $0x78] sm:$0xff] }
  0x92   : > { %1171 = vmatprep.subr.bf16.mxu1 %v1154_v6 }
  0x94   : > { %1098 = vmatmul.mubr.msk.f32.gmra.mrb[2].mxu1 %vm335_vm0, %v330_v16 }
  0x95   : > { %1100 = vmatprep.mubr.msk.f32.mxu1 %vm335_vm0, %v331_v17  ;;  %1173 = vmatpush3.bf16.msra.mxu1 %v1154_v6  ;;  %v650_v6 = vld [vmem:[#allocation8 + $0x90] sm:$0xff] }
  0x96   : > { %1175 = vmatprep.subr.bf16.mxu1 %v1158_v10 }
  0x98   : > { %1101 = vmatmul.mubr.msk.f32.gmra.mrb[4].mxu1 %vm335_vm0, %v332_v18 }
  0x99   : > { %1103 = vmatprep.mubr.msk.f32.mxu1 %vm335_vm0, %v333_v19  ;;  %1177 = vmatpush3.bf16.msra.mxu1 %v1158_v10  ;;  %v654_v10 = vld [vmem:[#allocation8 + $0xd0] sm:$0xff] }
  0x9a   : > { %1179 = vmatprep.subr.bf16.mxu1 %v1162_v13 }
  0x9c   : > { %1104 = vmatmul.mubr.msk.f32.gmra.mrb[6].mxu1 %vm335_vm0, %v334_v20 }
  0x9d   : > { %1181 = vmatpush3.bf16.msra.mxu1 %v1162_v13  ;;  %1138 = vmatprep.mubr.f32.mxu1 %v489_v21 }
 0x163   : > { %v1096_v22 = vpop.f32.mrb[0].mxu1 }
 0x164   : > { %v426_v23 = vpop.f32.mrb[1].mxu1 }
 0x165   : > { %v1182_v24 = vpack.c.bf16 %v1096_v22, %v426_v23 }
 0x167   : > { %v1099_v25 = vpop.f32.mrb[2].mxu1  ;;  %1183 = vmatprep.subr.bf16.mxu1 %v1182_v24  ;;  %1212 = vmatpush1.bf16.msra.mxu0 %v1182_v24 }
 0x168   : > { %v436_v26 = vpop.f32.mrb[3].mxu1  ;;  %1185 = vmatpush3.bf16.msra.mxu1 %v1182_v24  ;;  %1213 = vmatprep.subr.bf16.mxu0 %v1543_v0 }
 0x169   : > { %v1186_v27 = vpack.c.bf16 %v1099_v25, %v436_v26 }
 0x16b   : > { %v1102_v28 = vpop.f32.mrb[4].mxu1  ;;  %1187 = vmatprep.subr.bf16.mxu1 %v1186_v27  ;;  %1215 = vmatpush1.bf16.msra.mxu0 %v1186_v27 }
 0x16c   : > { %v446_v29 = vpop.f32.mrb[5].mxu1  ;;  %1189 = vmatpush3.bf16.msra.mxu1 %v1186_v27  ;;  %1216 = vmatprep.subr.bf16.mxu0 %v1543_v0 }
 0x16d   : > { %v1190_v30 = vpack.c.bf16 %v1102_v28, %v446_v29 }
 0x16f   : > { %v1105_v31 = vpop.f32.mrb[6].mxu1  ;;  %1191 = vmatprep.subr.bf16.mxu1 %v1190_v30  ;;  %1218 = vmatpush1.bf16.msra.mxu0 %v1190_v30 }
 0x170   : > { %v456_v32 = vpop.f32.mrb[7].mxu1  ;;  %1193 = vmatpush3.bf16.msra.mxu1 %v1190_v30  ;;  %1219 = vmatprep.subr.bf16.mxu0 %v1543_v0 }
 0x171   : > { %v1194_v33 = vpack.c.bf16 %v1105_v31, %v456_v32 }
 0x173   : > { %1195 = vmatprep.subr.bf16.mxu1 %v1194_v33  ;;  %1221 = vmatpush1.bf16.msra.mxu0 %v1194_v33 }
 0x174   : > { %1197 = vmatpush3.bf16.msra.mxu1 %v1194_v33  ;;  %1222 = vmatprep.subr.bf16.mxu0 %v1543_v0 }
 0x177   : > { %1139 = vmatmul.mubr.f32.vlgmr.msra.gmra.mrb[8].mxu1 %v490_v34 }
 0x178   : > { %1141 = vmatprep.mubr.f32.mxu1 %v491_v35 }
 0x17b   : > { %1142 = vmatmul.mubr.f32.gmra.mrb[10].mxu1 %v492_v36 }
 0x17c   : > { %1144 = vmatprep.mubr.f32.mxu1 %v493_v37 }
 0x17f   : > { %1145 = vmatmul.mubr.f32.gmra.mrb[12].mxu1 %v494_v38 }
 0x180   : > { %1147 = vmatprep.mubr.f32.mxu1 %v495_v39 }
 0x183   : > { %1148 = vmatmul.mubr.f32.gmra.mrb[14].mxu1 %v496_v40 }
 0x24a   : > { %v1140_v42 = vpop.f32.mrb[8].mxu1 }
 0x24b   : > { %v611_v43 = vadd.f32 %v1140_v42, %v1096_v22  ;;  %v563_v44 = vpop.f32.mrb[9].mxu1 }
 0x24c   : > { %v610_v45 = vadd.f32 %v563_v44, %v426_v23  ;;  %v1223_v46 = vpack.c.bf16 %v1140_v42, %v563_v44 }
 0x24e   : > { %v1143_v47 = vpop.f32.mrb[10].mxu1  ;;  %1224 = vmatpush1.bf16.msra.mxu0 %v1223_v46 }
 0x24f   : > { %v1808_v48 = vadd.f32 %v1143_v47, %v1099_v25  ;;  %v573_v49 = vpop.f32.mrb[11].mxu1  ;;  %1225 = vmatprep.subr.bf16.mxu0 %v1543_v0 }
 0x250   : > { %v612_v50 = vadd.f32 %v573_v49, %v436_v26  ;;  %v1226_v51 = vpack.c.bf16 %v1143_v47, %v573_v49 }
 0x252   : > { %v1146_v52 = vpop.f32.mrb[12].mxu1  ;;  %1227 = vmatpush1.bf16.msra.mxu0 %v1226_v51 }
 0x253   : > { %v1811_v53 = vadd.f32 %v1146_v52, %v1102_v28  ;;  %v583_v54 = vpop.f32.mrb[13].mxu1  ;;  %1228 = vmatprep.subr.bf16.mxu0 %v1543_v0 }
 0x254   : > { %v1814_v55 = vadd.f32 %v583_v54, %v446_v29  ;;  %v1229_v56 = vpack.c.bf16 %v1146_v52, %v583_v54 }
 0x256   : > { %v1149_v57 = vpop.f32.mrb[14].mxu1  ;;  %1230 = vmatpush1.bf16.msra.mxu0 %v1229_v56 }
 0x257   : > { %v1816_v58 = vadd.f32 %v1149_v57, %v1105_v31  ;;  %v593_v59 = vpop.f32.mrb[15].mxu1  ;;  %1231 = vmatprep.subr.bf16.mxu0 %v1543_v0  ;;  %v648_v0 = vld [vmem:[#allocation8 + $0x70] sm:$0xff] }
 0x258   : > { %v1819_v60 = vadd.f32 %v593_v59, %v456_v32  ;;  %v1232_v61 = vpack.c.bf16 %v1149_v57, %v593_v59 }
 0x25a   : > { %1233 = vmatpush1.bf16.msra.mxu0 %v1232_v61 }
 0x25d   : > { %747 = vmatmul.mubr.f32.vlgmr.msra.gmra.mrb[0].mxu0 %v642_v62 }
 0x25e   : > { %1019 = vmatprep.mubr.msk.f32.mxu0 %vm335_vm0, %v645_v63 }
 0x261   : > { %752 = vmatmul.mubr.f32.gmra.mrb[2].mxu0 %v644_v1 }
 0x262   : > { %1020 = vmatprep.mubr.msk.f32.mxu0 %vm335_vm0, %v647_v2 }
 0x265   : > { %757 = vmatmul.mubr.f32.gmra.mrb[4].mxu0 %v646_v3 }
 0x266   : > { %1021 = vmatprep.mubr.msk.f32.mxu0 %vm335_vm0, %v649_v4 }
 0x269   : > { %762 = vmatmul.mubr.f32.gmra.mrb[6].mxu0 %v648_v0 }
 0x26a   : > { %1022 = vmatprep.mubr.msk.f32.mxu0 %vm335_vm0, %v651_v5 }
 0x26d   : > { %767 = vmatmul.mubr.f32.gmra.mrb[8].mxu0 %v650_v6 }
 0x26e   : > { %1023 = vmatprep.mubr.msk.f32.mxu0 %vm335_vm0, %v653_v7 }
 0x271   : > { %772 = vmatmul.mubr.f32.gmra.mrb[10].mxu0 %v652_v8 }
 0x272   : > { %1024 = vmatprep.mubr.msk.f32.mxu0 %vm335_vm0, %v655_v9 }
 0x275   : > { %777 = vmatmul.mubr.f32.gmra.mrb[12].mxu0 %v654_v10 }
 0x276   : > { %1025 = vmatprep.mubr.msk.f32.mxu0 %vm335_vm0, %v657_v11 }
 0x279   : > { %782 = vmatmul.mubr.f32.gmra.mrb[14].mxu0 %v656_v12 }
 0x330   : > { %v748_v13 = vpop.f32.mrb[0].mxu0 }
 0x331   : > { %v787_v14 = vadd.f32 %v748_v13, %v610_v45  ;;  %v750_v15 = vpop.f32.mrb[1].mxu0 }
 0x333   : > { %795 = vst [vmem:[%s295_s21] sm:$0xff] %v787_v14 }
 0x334   : > { %v753_v16 = vpop.f32.mrb[2].mxu0 }
 0x335   : > { %v788_v17 = vadd.f32 %v753_v16, %v611_v43  ;;  %v755_v18 = vpop.f32.mrb[3].mxu0 }
 0x337   : > { %796 = vst [vmem:[%s295_s21 + $0x8] sm:$0xff] %v788_v17 }
 0x338   : > { %v758_v19 = vpop.f32.mrb[4].mxu0 }
 0x339   : > { %v789_v20 = vadd.f32 %v758_v19, %v612_v50  ;;  %v760_v21 = vpop.f32.mrb[5].mxu0 }
 0x33b   : > { %797 = vst [vmem:[%s295_s21 + $0x10] sm:$0xff] %v789_v20 }
 0x33c   : > { %v763_v22 = vpop.f32.mrb[6].mxu0 }
 0x33d   : > { %v790_v23 = vadd.f32 %v763_v22, %v1808_v48  ;;  %v765_v24 = vpop.f32.mrb[7].mxu0 }
 0x33f   : > { %798 = vst [vmem:[%s295_s21 + $0x18] sm:$0xff] %v790_v23 }
 0x340   : > { %v768_v25 = vpop.f32.mrb[8].mxu0 }
 0x341   : > { %1425 = shalt.err (!%p1422_p8)
}
 0x342   : > { %s1426_s9 = scalar_lea.hbm %s1837_s13, 512  ;;  %s1430_s2 = scalar_lea.hbm %s1934_s3, 1024 }
 0x343   : > { %p1427_p12 = scmp.ne.s32.totalorder %s1837_s13, %s1426_s9  ;;  %p1431_p6 = scmp.lt.u32.totalorder %s1837_s13, %s1934_s3 }
 0x344   : > { %p1432_p13 = scmp.lt.u32.totalorder %s1430_s2, %s1426_s9  ;;  %p1434_p5 = scmp.lt.u32.totalorder %s1426_s9, %s1837_s13 }
 0x345   : > { %p1428_p11 = pnand %p1427_p12, %p1665_p10 }
 0x346   : > { %p1433_p0 = por %p1432_p13, %p1431_p6 }
 0x347   : > { %p1429_p3 = pneg %p1428_p11 }
 0x348   : > { %p1435_p9 = por %p1434_p5, %p1433_p0 }
 0x34a   : > { %p1436_p1 = pnand %p1435_p9, %p1429_p3 }
 0x34c   : > { %1439 = shalt.err (!%p1436_p1)
}
 0x34d   : > { %s1545_s21 = smov 128   ;;  %s1546_s5 = smov 8   ;;  %v791_v26 = vadd.f32 %v768_v25, %v1814_v55  ;;  %v770_v27 = vpop.f32.mrb[9].mxu0 }
 0x34e   : > { %1242 = dma.vmem_to_hbm [thread:$0]  (%p1665_p10), %s1830_s23, 512, %s1837_s13, %s804_s22, %s1545_s21, %s1545_s21, %s1546_s5   ;;  %v773_v28 = vpop.f32.mrb[10].mxu0 }
 0x34f   : > { %s302_s10 = scalar_lea.vmem [#allocation10], %s1772_s11  ;;  %v792_v29 = vadd.f32 %v773_v28, %v1811_v53  ;;  %v775_v30 = vpop.f32.mrb[11].mxu0  ;;  %s1879_s13 = scalar_lea.hbm %s1935_s4, %s1036_s30 }
 0x350   : > { %799 = vst [vmem:[%s302_s10] sm:$0xff] %v791_v26  ;;  %v778_v31 = vpop.f32.mrb[12].mxu0  ;;  %s840_s12 = sshll.u32 %s302_s10, 4  ;;  %s809_s22 = scalar_lea.sflag [#allocation11], %s1769_s29  ;;  %s1871_s12 = int_to_ptr.vmem [resolvable:$true] %s840_s12 }
 0x351   : > { %800 = vst [vmem:[%s302_s10 + $0x8] sm:$0xff] %v792_v29  ;;  %v793_v32 = vadd.f32 %v778_v31, %v1819_v60  ;;  %v780_v33 = vpop.f32.mrb[13].mxu0  ;;  %s1440_s0 = scalar_lea.vmem %s1871_s12, 512  ;;  %s1547_s6 = smov [#allocation10]  }
 0x352   : > { %v783_v34 = vpop.f32.mrb[14].mxu0  ;;  %p1441_p2 = scmp.ne.s32.totalorder %s1871_s12, %s1440_s0  ;;  %s1444_s27 = sshll.u32 %s1547_s6, 4  ;;  %s1445_s27 = int_to_ptr.vmem [resolvable:$false] %s1444_s27 }
 0x353   : > { %801 = vst [vmem:[%s302_s10 + $0x10] sm:$0xff] %v793_v32  ;;  %v794_v35 = vadd.f32 %v783_v34, %v1816_v58  ;;  %v785_v36 = vpop.f32.mrb[15].mxu0  ;;  %s1446_s9 = scalar_lea.vmem %s1445_s27, 1024  ;;  %p1447_p8 = scmp.lt.s32.totalorder %s1871_s12, %s1445_s27 }
 0x354   : > { %p1442_p7 = pnand %p1441_p2, %p1665_p10  ;;  %p1448_p12 = scmp.lt.s32.totalorder %s1446_s9, %s1440_s0 }
 0x355   : > { %802 = vst [vmem:[%s302_s10 + $0x18] sm:$0xff] %v794_v35 }
 0x356   : > { %p1443_p4 = pneg %p1442_p7  ;;  %p1449_p11 = por %p1448_p12, %p1447_p8 }
 0x358   : > { %p1450_p3 = pnand %p1449_p11, %p1443_p4 }
 0x35a   : > { %1453 = shalt.err (!%p1450_p3)
}
 0x35b   : > { %s1454_s18 = scalar_lea.hbm %s1879_s13, 512  ;;  %s1458_s8 = scalar_lea.hbm %s1935_s4, 1024 }
 0x35c   : > { %p1455_p6 = scmp.ne.s32.totalorder %s1879_s13, %s1454_s18  ;;  %p1459_p5 = scmp.lt.u32.totalorder %s1879_s13, %s1935_s4 }
 0x35d   : > { %p1460_p9 = scmp.lt.u32.totalorder %s1458_s8, %s1454_s18  ;;  %p1462_p2 = scmp.lt.u32.totalorder %s1454_s18, %s1879_s13 }
 0x35e   : > { %p1456_p13 = pnand %p1455_p6, %p1665_p10 }
 0x35f   : > { %p1461_p1 = por %p1460_p9, %p1459_p5 }
 0x360   : > { %p1457_p0 = pneg %p1456_p13 }
 0x361   : > { %p1463_p7 = por %p1462_p2, %p1461_p1 }
 0x363   : > { %p1464_p4 = pnand %p1463_p7, %p1457_p0 }
 0x365   : > { %1467 = shalt.err (!%p1464_p4)
}
 0x366   : > { %1243 = dma.vmem_to_hbm [thread:$0]  (%p1665_p10), %s1871_s12, 512, %s1879_s13, %s809_s22, %s1545_s21, %s1545_s21, %s1546_s5  }
 0x367 PF: > { %s855_s26 = sand.u32 1, %s1514_s15   ;;  %p1957_p8 = scmp.ne.s32.totalorder %s1943_s24, 0 }
 0x368   : > { %p1958_p12 = scmp.ge.s32.totalorder %s1534_s20, 2  ;;  %s856_s10 = scalar_lea.sflag [#allocation5], %s855_s26 }
 0x36a   : > { %p1258_p11 = pnand %p1958_p12, %p1957_p8 }
 0x36c   : > { %1505 = dma.done.wait (!%p1258_p11), %s856_s10, 512  }
 0x36d   : > { %1507 = vsyncadd (!%p1258_p11), %s856_s10, 4294966784  ;;  %s865_s28 = scalar_lea.sflag [#allocation11], %s855_s26 }
 0x36e   : > { %1509 = dma.done.wait (!%p1258_p11), %s865_s28, 512  }
 0x36f   : > { %1511 = vsyncadd (!%p1258_p11), %s865_s28, 4294966784  ;;  %s27_s20 = sadd.s32 1, %s1534_s20   ;;  %s1959_s29 = sld [smem:[#allocation17_spill]] }
 0x370   : > { %p24_p3 = scmp.ge.s32.totalorder %s27_s20, 4   ;;  %s1960_s15 = smov %s1518_s16 }
 0x371   : > { %s1961_s16 = smov %s1522_s17  ;;  %s1962_s17 = smov %s1676_s7 }
 0x372   : > { %s1963_s18 = smov %s1530_s19  ;;  %26 = sbr.rel (!%p24_p3) target bundleno = 13 (0xd), region = 111 }
 0x375   : > { %s1964_s19 = smov %s1959_s29 }
 0x379   :  { %870 = vsyncpa [#allocation4], 1 }
 0x37a   :  { %872 = vsyncpa [#allocation4 + $0x1], 1 }
 0x37b   :  { %873 = vsyncpa [#allocation7], 1 }
 0x37c   :  { %875 = vsyncpa [#allocation7 + $0x1], 1 }
 0x37d   :  { %876 = vsyncpa [#allocation5], 1 }
 0x37e   :  { %878 = vsyncpa [#allocation5 + $0x1], 1 }
 0x37f   :  { %879 = vsyncpa [#allocation11], 1 }
 0x380   :  { %881 = vsyncpa [#allocation11 + $0x1], 1 }

</bundles_post_ra>
